<compile_context>
chip_gen: v5e
topology: v5e:2x2
jax: 0.10.0
libtpu: 0.0.40
codegen_flags: <defaults>
</compile_context>

<pallas_src>
import math
import jax
import jax.numpy as jnp
from jax.experimental import pallas as pl
from jax.experimental.pallas import tpu as pltpu


def _round_up(n, m):
    return ((n + m - 1) // m) * m


def _mlp_kernel(x_ref, w1_ref, b1_ref, w2_ref, b2_ref, o_ref):
    # fc1: (TB, in) @ (in, hidden) on the MXU (bf16 inputs, f32 accumulation).
    h = jnp.dot(x_ref[...], w1_ref[...], preferred_element_type=jnp.float32)
    # Bias + ReLU epilogue in f32; b1 (1, hidden) broadcasts over TB sublanes.
    h = jnp.maximum(h + b1_ref[...], 0.0)
    # fc2: hidden -> 1 as VPU multiply + lane reduce (keeps the MXU free
    # instead of reloading it for a single output column).
    y = jnp.sum(h * w2_ref[...], axis=-1, keepdims=True) + b2_ref[0, 0]
    o_ref[...] = y.astype(o_ref.dtype)


def age_regression_head(x, w1, b1, w2, b2, *, tb=2048):
    """y = relu(x @ w1 + b1) @ w2 + b2.

    x: (B, in_features); w1: (in_features, hidden); b1: (hidden,) or (1, hidden);
    w2: (hidden, 1) or (hidden,); b2: scalar-like.  Returns (B, 1).
    """
    B, in_features = x.shape
    in_f_w, hidden = w1.shape
    assert in_f_w == in_features

    # Normalize parameter shapes (f32 for the epilogue math).
    b1_row = jnp.asarray(b1, jnp.float32).reshape(1, hidden)
    w2_row = jnp.asarray(w2, jnp.float32).reshape(1, hidden)   # (hidden,1) -> row
    b2_s = jnp.asarray(b2, jnp.float32).reshape(1, 1)

    # Stream activations / fc1 weights as bf16 (halves HBM bytes on the only
    # large operand); accumulation stays f32 inside the kernel.
    x_bf = x.astype(jnp.bfloat16)
    w1_bf = w1.astype(jnp.bfloat16)

    # Batch tile: multiple of 8 sublanes, large enough to amortize per-step
    # pipeline overhead, capped so double-buffered tiles fit scoped VMEM on
    # every generation (incl. v7x's smaller VMEM).
    TB = _round_up(min(int(tb), _round_up(B, 8)), 8)
    B_pad = _round_up(B, TB)
    if B_pad != B:
        x_bf = jnp.pad(x_bf, ((0, B_pad - B), (0, 0)))  # padded rows sliced off below
    n_tiles = B_pad // TB

    out = pl.pallas_call(
        _mlp_kernel,
        out_shape=jax.ShapeDtypeStruct((B_pad, 1), jnp.float32),
        grid_spec=pltpu.PrefetchScalarGridSpec(
            num_scalar_prefetch=0,
            grid=(n_tiles,),
            in_specs=[
                pl.BlockSpec((TB, in_features), lambda i: (i, 0)),      # x: batch-tiled
                pl.BlockSpec((in_features, hidden), lambda i: (0, 0)),  # w1: VMEM-resident
                pl.BlockSpec((1, hidden), lambda i: (0, 0)),            # b1: VMEM-resident
                pl.BlockSpec((1, hidden), lambda i: (0, 0)),            # w2 row: VMEM-resident
                pl.BlockSpec((1, 1), lambda i: (0, 0),
                             memory_space=pltpu.MemorySpace.SMEM),      # b2: SMEM scalar
            ],
            out_specs=pl.BlockSpec((TB, 1), lambda i: (i, 0)),
        ),
        compiler_params=pltpu.CompilerParams(
            dimension_semantics=("parallel",)),
    )(x_bf, w1_bf, b1_row, w2_row, b2_s)

    return out[:B].astype(x.dtype)


def init_params(key, in_features=512, hidden_dim=128, dtype=jnp.float32):
    """Deterministic init matching nn.Linear's default U(-1/sqrt(fan_in), +1/sqrt(fan_in))."""
    k1, k2, k3, k4 = jax.random.split(key, 4)
    bound1 = 1.0 / math.sqrt(in_features)
    bound2 = 1.0 / math.sqrt(hidden_dim)
    w1 = jax.random.uniform(k1, (in_features, hidden_dim), dtype, -bound1, bound1)
    b1 = jax.random.uniform(k2, (hidden_dim,), dtype, -bound1, bound1)
    w2 = jax.random.uniform(k3, (hidden_dim, 1), dtype, -bound2, bound2)
    b2 = jax.random.uniform(k4, (1,), dtype, -bound2, bound2)
    return w1, b1, w2, b2


def _reference(x, w1, b1, w2, b2):
    # bf16-aware reference: same streamed dtypes as the kernel, f32 math.
    hp = jax.lax.Precision.HIGHEST
    xb = x.astype(jnp.bfloat16).astype(jnp.float32)
    w1b = w1.astype(jnp.bfloat16).astype(jnp.float32)
    h = jnp.maximum(jnp.dot(xb, w1b, precision=hp) + b1.reshape(1, -1), 0.0)
    return jnp.dot(h, w2.reshape(-1, 1), precision=hp) + b2.reshape(1, 1)


if __name__ == "__main__":
    key = jax.random.PRNGKey(0)
    k_x, k_p, k_x2 = jax.random.split(key, 3)

    in_features, hidden_dim = 512, 128
    w1, b1, w2, b2 = init_params(k_p, in_features, hidden_dim)

    # Small shape consistent with the module (B=2, in_features=512).
    B = 2
    x = jax.random.normal(k_x, (B, in_features), jnp.float32)
    y = jax.block_until_ready(age_regression_head(x, w1, b1, w2, b2))
    ref = _reference(x, w1, b1, w2, b2)
    assert y.shape == (B, 1)
    assert jnp.allclose(y, ref, atol=2e-3, rtol=2e-3), "mismatch vs reference (B=2)"

    # Multi-tile grid + non-divisible batch (exercises tiling / padding path).
    B2 = 300
    x2 = jax.random.normal(k_x2, (B2, in_features), jnp.float32)
    y2 = jax.block_until_ready(age_regression_head(x2, w1, b1, w2, b2, tb=128))
    ref2 = _reference(x2, w1, b1, w2, b2)
    assert y2.shape == (B2, 1)
    assert jnp.allclose(y2, ref2, atol=2e-3, rtol=2e-3), "mismatch vs reference (B=300)"

    print("KERNEL_OK")
</pallas_src>

<mosaic_0001>
module attributes {stable_mosaic.version = 11 : i64} {
  func.func @_mlp_kernel(%arg0: i32, %arg1: memref<8x512xbf16, #tpu.memory_space<vmem>>, %arg2: memref<512x128xbf16, #tpu.memory_space<vmem>>, %arg3: memref<1x128xf32, #tpu.memory_space<vmem>>, %arg4: memref<1x128xf32, #tpu.memory_space<vmem>>, %arg5: memref<1x1xf32, #tpu.memory_space<smem>>, %arg6: memref<8x1xf32, #tpu.memory_space<vmem>>) attributes {dimension_semantics = [#tpu.dimension_semantics<parallel>], iteration_bounds = array<i64: 1>, scalar_prefetch = 0 : i64, scratch_operands = 0 : i64, tpu.core_type = #tpu.core_type<tc>, window_params = [{transform_indices = @transform_0, window_bounds = array<i64: 8, 512>}, {pipeline_mode = #tpu.pipeline_mode<synchronous>, transform_indices = @transform_1, window_bounds = array<i64: 512, 128>}, {pipeline_mode = #tpu.pipeline_mode<synchronous>, transform_indices = @transform_2, window_bounds = array<i64: 1, 128>}, {pipeline_mode = #tpu.pipeline_mode<synchronous>, transform_indices = @transform_3, window_bounds = array<i64: 1, 128>}, {transform_indices = @transform_4, window_bounds = array<i64: 1, 1>}, {transform_indices = @transform_5, window_bounds = array<i64: 8, 1>}]} {
    %c0 = arith.constant 0 : index
    %c0_0 = arith.constant 0 : index
    %0 = vector.load %arg1[%c0, %c0_0] : memref<8x512xbf16, #tpu.memory_space<vmem>>, vector<8x512xbf16>
    %c0_1 = arith.constant 0 : index
    %c0_2 = arith.constant 0 : index
    %1 = vector.load %arg2[%c0_1, %c0_2] : memref<512x128xbf16, #tpu.memory_space<vmem>>, vector<512x128xbf16>
    %cst = arith.constant dense<0.000000e+00> : vector<8x128xf32>
    %2 = tpu.matmul %0, %1, %cst {dimension_numbers = #tpu.dot_dimension_numbers<[1], [0], [0], [1], [0, 0, 1, 1], [], []>} : vector<8x512xbf16>, vector<512x128xbf16>, vector<8x128xf32> -> vector<8x128xf32>
    %c0_3 = arith.constant 0 : index
    %c0_4 = arith.constant 0 : index
    %3 = vector.load %arg3[%c0_3, %c0_4] : memref<1x128xf32, #tpu.memory_space<vmem>>, vector<1x128xf32>
    %4 = vector.broadcast %3 : vector<1x128xf32> to vector<8x128xf32>
    %5 = arith.addf %2, %4 : vector<8x128xf32>
    %cst_5 = arith.constant 0.000000e+00 : f32
    %6 = vector.broadcast %cst_5 : f32 to vector<8x128xf32>
    %7 = arith.maximumf %5, %6 : vector<8x128xf32>
    %c0_6 = arith.constant 0 : index
    %c0_7 = arith.constant 0 : index
    %8 = vector.load %arg4[%c0_6, %c0_7] : memref<1x128xf32, #tpu.memory_space<vmem>>, vector<1x128xf32>
    %9 = vector.broadcast %8 : vector<1x128xf32> to vector<8x128xf32>
    %10 = arith.mulf %7, %9 : vector<8x128xf32>
    %cst_8 = arith.constant dense<0.000000e+00> : vector<8xf32>
    %11 = vector.multi_reduction <add>, %10, %cst_8 [1] : vector<8x128xf32> to vector<8xf32>
    %12 = vector.shape_cast %11 : vector<8xf32> to vector<8x1xf32>
    %c0_9 = arith.constant 0 : index
    %c0_10 = arith.constant 0 : index
    %13 = memref.load %arg5[%c0_9, %c0_10] : memref<1x1xf32, #tpu.memory_space<smem>>
    %14 = vector.broadcast %13 : f32 to vector<8x1xf32>
    %15 = arith.addf %12, %14 : vector<8x1xf32>
    %c0_11 = arith.constant 0 : index
    %c0_12 = arith.constant 0 : index
    %16 = vector.load %arg6[%c0_11, %c0_12] : memref<8x1xf32, #tpu.memory_space<vmem>>, vector<8x1xf32>
    tpu.vector_store %arg6[%c0_11, %c0_12], %15 {strides = array<i32>} : memref<8x1xf32, #tpu.memory_space<vmem>>, vector<8x1xf32>,
    return
  }
  func.func @transform_0(%arg0: i32) -> (i32, i32) {
    %c0_i32 = arith.constant 0 : i32
    %c0_i32_0 = arith.constant 0 : i32
    return %arg0, %c0_i32 : i32, i32
  }
  func.func @transform_1(%arg0: i32) -> (i32, i32) {
    %c0_i32 = arith.constant 0 : i32
    %c0_i32_0 = arith.constant 0 : i32
    %c0_i32_1 = arith.constant 0 : i32
    return %c0_i32, %c0_i32_0 : i32, i32
  }
  func.func @transform_2(%arg0: i32) -> (i32, i32) {
    %c0_i32 = arith.constant 0 : i32
    %c0_i32_0 = arith.constant 0 : i32
    %c0_i32_1 = arith.constant 0 : i32
    return %c0_i32, %c0_i32_0 : i32, i32
  }
  func.func @transform_3(%arg0: i32) -> (i32, i32) {
    %c0_i32 = arith.constant 0 : i32
    %c0_i32_0 = arith.constant 0 : i32
    %c0_i32_1 = arith.constant 0 : i32
    return %c0_i32, %c0_i32_0 : i32, i32
  }
  func.func @transform_4(%arg0: i32) -> (i32, i32) {
    %c0_i32 = arith.constant 0 : i32
    %c0_i32_0 = arith.constant 0 : i32
    %c0_i32_1 = arith.constant 0 : i32
    return %c0_i32, %c0_i32_0 : i32, i32
  }
  func.func @transform_5(%arg0: i32) -> (i32, i32) {
    %c0_i32 = arith.constant 0 : i32
    %c0_i32_0 = arith.constant 0 : i32
    return %arg0, %c0_i32 : i32, i32
  }
}

</mosaic_0001>

<bundles_post_ra>
// kernel: tpu_custom_call.1
= control target key start
LH: loop header
LB: loop body
LE: loop exit
PB: predicated region body
PF: predicated region fallthrough
CT: control target
= control target key end

     0   :  { %11 = vsyncpa [#allocation4], 0  ;;  %s668_s0 = inlined_call_operand.hbm [shape: bf16[8,512], index: 0, kind: input, shape index: {}]   ;;  %s669_s1 = inlined_call_operand.hbm [shape: bf16[512,128], index: 1, kind: input, shape index: {}]   ;;  %s670_s2 = inlined_call_operand.vmem [shape: f32[1,128], index: 2, kind: input, shape index: {}]   ;;  %s671_s3 = inlined_call_operand.vmem [shape: f32[1,128], index: 3, kind: input, shape index: {}]   ;;  %s672_s4 = inlined_call_operand.<no memory space> [shape: f32[1,1], index: 4, kind: input, shape index: {}]   ;;  %s673_s5 = inlined_call_operand.vmem [shape: f32[8,1], index: 5, kind: output, shape index: {}]  }
   0x1   :  { %s18_s20 = sshll.u32 %s668_s0, 4  ;;  %s19_s20 = int_to_ptr.hbm [resolvable:$true] %s18_s20 }
   0x2   :  { %12 = vsyncpa [#allocation6], 0  ;;  %s616_s21 = smov [#allocation3]   ;;  %s28_s25 = sshll.u32 %s669_s1, 4  ;;  %s29_s25 = int_to_ptr.hbm [resolvable:$true] %s28_s25 }
   0x3   :  { %s20_s22 = sshll.u32 %s616_s21, 4  ;;  %s617_s26 = smov [#allocation5]   ;;  %s21_s22 = int_to_ptr.vmem [resolvable:$true] %s20_s22 }
   0x4   :  { %23 = dma.hbm_to_vmem [thread:$0]  %s19_s20, 256, %s21_s22, [#allocation4]  }
   0x5   :  { %s30_s27 = sshll.u32 %s617_s26, 4  ;;  %s618_s28 = smov 64   ;;  %s31_s27 = int_to_ptr.vmem [resolvable:$true] %s30_s27 }
   0x6   :  { %s619_s29 = smov 4  }
   0x7   :  { %36 = dma.hbm_to_vmem [thread:$0]  %s29_s25, 4096, %s31_s27, [#allocation6], %s618_s28, %s618_s28, %s619_s29  }
   0x8   :  { %612 = dma.done.wait [#allocation4], 256  }
   0x9   :  { %613 = vsyncadd [#allocation4], 4294967040 }
   0xa   :  { %614 = dma.done.wait [#allocation6], 4096  }
   0xb   :  { %615 = vsyncadd [#allocation6], 4294963200  ;;  %v533_v0 = vld [vmem:[#allocation5 + $0x38] sm:$0xff]  ;;  %v532_v4 = vld [vmem:[#allocation5 + $0x30] sm:$0xff]  ;;  %v388_v58 = vstv %s672_s4  ;;  %vm390_vm0 = vcmask 7168  }
   0xc   :  { %v541_v1 = vld [vmem:[#allocation5 + $0x78] sm:$0xff]  ;;  %327 = vmatpush.bf16.msra.mxu0 %v533_v0  ;;  %v540_v5 = vld [vmem:[#allocation5 + $0x70] sm:$0xff]  ;;  %v531_v8 = vld [vmem:[#allocation5 + $0x28] sm:$0xff] }
   0xd   :  { %v549_v2 = vld [vmem:[#allocation5 + $0xb8] sm:$0xff]  ;;  %340 = vmatpush.bf16.msra.mxu1 %v541_v1  ;;  %v548_v6 = vld [vmem:[#allocation5 + $0xb0] sm:$0xff]  ;;  %v539_v9 = vld [vmem:[#allocation5 + $0x68] sm:$0xff] }
   0xe   :  { %v557_v3 = vld [vmem:[#allocation5 + $0xf8] sm:$0xff]  ;;  %353 = vmatpush.bf16.msra.mxu2 %v549_v2  ;;  %v556_v7 = vld [vmem:[#allocation5 + $0xf0] sm:$0xff]  ;;  %v547_v10 = vld [vmem:[#allocation5 + $0xa8] sm:$0xff] }
   0xf   :  { %366 = vmatpush.bf16.msra.mxu3 %v557_v3  ;;  %v555_v11 = vld [vmem:[#allocation5 + $0xe8] sm:$0xff]  ;;  %v530_v12 = vld [vmem:[#allocation5 + $0x20] sm:$0xff]  ;;  %v529_v16 = vld [vmem:[#allocation5 + $0x18] sm:$0xff] }
  0x10   :  { %328 = vmatpush.bf16.msra.mxu0 %v532_v4  ;;  %v538_v13 = vld [vmem:[#allocation5 + $0x60] sm:$0xff]  ;;  %v537_v17 = vld [vmem:[#allocation5 + $0x58] sm:$0xff]  ;;  %v528_v20 = vld [vmem:[#allocation5 + $0x10] sm:$0xff] }
  0x11   :  { %341 = vmatpush.bf16.msra.mxu1 %v540_v5  ;;  %v546_v14 = vld [vmem:[#allocation5 + $0xa0] sm:$0xff]  ;;  %v545_v18 = vld [vmem:[#allocation5 + $0x98] sm:$0xff]  ;;  %v536_v21 = vld [vmem:[#allocation5 + $0x50] sm:$0xff] }
  0x12   :  { %354 = vmatpush.bf16.msra.mxu2 %v548_v6  ;;  %v554_v15 = vld [vmem:[#allocation5 + $0xe0] sm:$0xff]  ;;  %v553_v19 = vld [vmem:[#allocation5 + $0xd8] sm:$0xff]  ;;  %v544_v22 = vld [vmem:[#allocation5 + $0x90] sm:$0xff] }
  0x13   :  { %367 = vmatpush.bf16.msra.mxu3 %v556_v7  ;;  %v552_v23 = vld [vmem:[#allocation5 + $0xd0] sm:$0xff]  ;;  %v527_v24 = vld [vmem:[#allocation5 + $0x8] sm:$0xff]  ;;  %v52_v29 = vld [vmem:[#allocation3 + $0x8] sm:$0xff] }
  0x14   :  { %329 = vmatpush.bf16.msra.mxu0 %v531_v8  ;;  %v535_v25 = vld [vmem:[#allocation5 + $0x48] sm:$0xff]  ;;  %v51_v26 = vld [vmem:[#allocation3] sm:$0xff]  ;;  %v526_v32 = vld [vmem:[#allocation5] sm:$0xff]  ;;  %v125_v34 = vunpack.c.l.b16 %v52_v29  ;;  %v126_v35 = vunpack.c.h.b16 %v52_v29 }
  0x15   :  { %342 = vmatpush.bf16.msra.mxu1 %v539_v9  ;;  %v543_v27 = vld [vmem:[#allocation5 + $0x88] sm:$0xff]  ;;  %v123_v30 = vunpack.c.l.b16 %v51_v26  ;;  %v124_v31 = vunpack.c.h.b16 %v51_v26  ;;  %v534_v33 = vld [vmem:[#allocation5 + $0x40] sm:$0xff]  ;;  %v562_v42 = vld [vmem:[%s670_s2] ss:$0 sm:$0xff] }
  0x16   :  { %355 = vmatpush.bf16.msra.mxu2 %v547_v10  ;;  %v551_v28 = vld [vmem:[#allocation5 + $0xc8] sm:$0xff]  ;;  %v542_v36 = vld [vmem:[#allocation5 + $0x80] sm:$0xff]  ;;  %v129_v40 = vpack.c.b16 %v125_v34, %v125_v34  ;;  %v130_v41 = vpack.c.b16 %v126_v35, %v126_v35  ;;  %v563_v53 = vld [vmem:[%s671_s3] ss:$0 sm:$0xff] }
  0x17   :  { %368 = vmatpush.bf16.msra.mxu3 %v555_v11  ;;  %v550_v37 = vld [vmem:[#allocation5 + $0xc0] sm:$0xff]  ;;  %v127_v38 = vpack.c.b16 %v123_v30, %v123_v30  ;;  %v128_v39 = vpack.c.b16 %v124_v31, %v124_v31 }
  0x18   :  { %330 = vmatpush.bf16.msra.mxu0 %v530_v12 }
  0x19   :  { %343 = vmatpush.bf16.msra.mxu1 %v538_v13 }
  0x1a   :  { %356 = vmatpush.bf16.msra.mxu2 %v546_v14 }
  0x1b   :  { %369 = vmatpush.bf16.msra.mxu3 %v554_v15 }
  0x1c   :  { %331 = vmatpush.bf16.msra.mxu0 %v529_v16 }
  0x1d   :  { %344 = vmatpush.bf16.msra.mxu1 %v537_v17 }
  0x1e   :  { %357 = vmatpush.bf16.msra.mxu2 %v545_v18 }
  0x1f   :  { %370 = vmatpush.bf16.msra.mxu3 %v553_v19 }
  0x20   :  { %332 = vmatpush.bf16.msra.mxu0 %v528_v20 }
  0x21   :  { %345 = vmatpush.bf16.msra.mxu1 %v536_v21 }
  0x22   :  { %358 = vmatpush.bf16.msra.mxu2 %v544_v22 }
  0x23   :  { %371 = vmatpush.bf16.msra.mxu3 %v552_v23 }
  0x24   :  { %333 = vmatpush.bf16.msra.mxu0 %v527_v24 }
  0x25   :  { %346 = vmatpush.bf16.msra.mxu1 %v535_v25 }
  0x26   :  { %359 = vmatpush.bf16.msra.mxu2 %v543_v27 }
  0x27   :  { %372 = vmatpush.bf16.msra.mxu3 %v551_v28 }
  0x28   :  { %334 = vmatpush.bf16.msra.mxu0 %v526_v32 }
  0x29   :  { %347 = vmatpush.bf16.msra.mxu1 %v534_v33 }
  0x2a   :  { %360 = vmatpush.bf16.msra.mxu2 %v542_v36 }
  0x2b   :  { %373 = vmatpush.bf16.msra.mxu3 %v550_v37  ;;  %335 = vmatmul.bf16.vlgmr.msra.gmra.mxu0 %v127_v38 }
  0x2c   :  { %348 = vmatmul.bf16.vlgmr.msra.gmra.mxu1 %v128_v39 }
  0x2d   :  { %361 = vmatmul.bf16.vlgmr.msra.gmra.mxu2 %v129_v40 }
  0x2e   :  { %374 = vmatmul.bf16.vlgmr.msra.gmra.mxu3 %v130_v41 }
  0xa8   :  { %v336_v43 = vpop.f32.mrf.mxu0 }
  0xa9   :  { %v349_v44 = vpop.f32.mrf.mxu1  ;;  %v337_v45 = vadd.f32 %v562_v42, %v336_v43 }
  0xab   :  { %v350_v46 = vadd.f32 %v349_v44, %v337_v45 }
  0xb0   :  { %v362_v47 = vpop.f32.mrf.mxu2  ;;  %v338_v50 = vpop.f32.mrf.mxu0 }
  0xb1   :  { %v375_v48 = vpop.f32.mrf.mxu3  ;;  %v363_v49 = vadd.f32 %v362_v47, %v350_v46  ;;  %v351_v51 = vpop.f32.mrf.mxu1 }
  0xb3   :  { %v376_v52 = vadd.f32 %v375_v48, %v363_v49 }
  0xb5   :  { %v379_v54 = vmax.f32 %v376_v52, 0.0 }
  0xb7   :  { %v384_v55 = vmul.f32 %v563_v53, %v379_v54 }
  0xb8   :  { %v364_v56 = vpop.f32.mrf.mxu2 }
  0xb9   :  { %v377_v57 = vpop.f32.mrf.mxu3  ;;  %385 = vadd.xlane.f32.xlu0 %v384_v55 }
 0x12c   :  { %v386_v59 = vpop.xlane.xlu0 %385 }
 0x12d   :  { %v389_v60 = vadd.f32 %v388_v58, %v386_v59 }
 0x12f   :  { %391 = vst.msk [vmem:[%s673_s5] sm:$0xff] %vm390_vm0, %v389_v60 }
 0x130   :  { %396 = vsyncpa [#allocation4], 1 }
 0x131   :  { %397 = vsyncpa [#allocation6], 1 }

</bundles_post_ra>
